<compile_context>
chip_gen: v7x
topology: tpu7x:2x2x1
jax: 0.10.0
libtpu: 0.0.40
codegen_flags: <defaults>
</compile_context>

<pallas_src>
import functools
import math

import jax
import jax.numpy as jnp
from jax.experimental import pallas as pl
from jax.experimental.pallas import tpu as pltpu


def _round_up(x, m):
    return (x + m - 1) // m * m


def _pack_params(w1, b1, w2, b2, w3, b3):
    """Pack all weights/biases into one 2-D array (sections 8-row aligned).

    Returns (packed, offsets) where offsets are the static starting rows of
    (w1, b1, w2, b2, w3, b3) inside `packed`. Columns are padded with zeros to
    max(n_hidden, n_output); the kernel slices the live columns statically.
    """
    cols = max(w1.shape[1], w2.shape[1], w3.shape[1])
    sections = [w1, b1, w2, b2, w3, b3]
    offsets, padded, row = [], [], 0
    for s in sections:
        offsets.append(row)
        r, c = s.shape
        r8 = _round_up(r, 8)
        padded.append(jnp.pad(s.astype(jnp.float32), ((0, r8 - r), (0, cols - c))))
        row += r8
    return jnp.concatenate(padded, axis=0), tuple(offsets)


def mlr_kernel(x_ref, p_ref, o_ref, *, dims, offs):
    n_input, n_hidden, n_output = dims
    o_w1, o_b1, o_w2, o_b2, o_w3, o_b3 = offs

    if n_output == 1:
        # softmax over a width-1 axis is identically 1.0 (matches the PyTorch
        # reference exactly) -> all three layers are dead work; skip them.
        o_ref[...] = jnp.ones_like(o_ref)
        return

    x = x_ref[...]

    # Static slices of the single resident packed-parameter block.
    w1 = p_ref[o_w1:o_w1 + n_input, :n_hidden]
    b1 = p_ref[o_b1:o_b1 + 1, :n_hidden]
    w2 = p_ref[o_w2:o_w2 + n_hidden, :n_hidden]
    b2 = p_ref[o_b2:o_b2 + 1, :n_hidden]
    w3 = p_ref[o_w3:o_w3 + n_hidden, :n_output]
    b3 = p_ref[o_b3:o_b3 + 1, :n_output]

    # Layer 1: Linear + ReLU
    h1 = jnp.maximum(jnp.dot(x, w1, preferred_element_type=jnp.float32) + b1, 0.0)
    # Layer 2: Linear + ReLU
    h2 = jnp.maximum(jnp.dot(h1, w2, preferred_element_type=jnp.float32) + b2, 0.0)
    # Layer 3: Linear
    logits = jnp.dot(h2, w3, preferred_element_type=jnp.float32) + b3

    # Numerically stable softmax over the feature axis (dim=1).
    m = jnp.max(logits, axis=1, keepdims=True)
    e = jnp.exp(logits - m)
    denom = jnp.sum(e, axis=1, keepdims=True)
    inv = 1.0 / denom                 # per-row exact reciprocal (tile_b divides)
    o_ref[...] = e * inv              # broadcast multiply over the feature axis


def mlr_forward(x, w1, b1, w2, b2, w3, b3, *, tile_b=None):
    B, n_input = x.shape
    n_hidden = w1.shape[1]
    n_output = w3.shape[1]

    # --- Batch tiling ---------------------------------------------------
    B8 = _round_up(B, 8)
    if tile_b is None:
        # At most 2 equal tiles: balances v7x's two TensorCores (grid axis is
        # "parallel"); costs one extra ~0.35us sequential step on v5e/v6e.
        # Cap at 4096 rows to stay well inside every scoped-VMEM default.
        tile_b = min(_round_up(pl.cdiv(B8, 2), 8), 4096)
    tile_b = max(8, _round_up(min(tile_b, B8), 8))
    B_pad = _round_up(B, tile_b)
    if B_pad != B:
        x = jnp.pad(x, ((0, B_pad - B), (0, 0)))

    grid = (B_pad // tile_b,)

    packed, offs = _pack_params(w1, b1, w2, b2, w3, b3)
    kernel = functools.partial(
        mlr_kernel, dims=(n_input, n_hidden, n_output), offs=offs)

    out = pl.pallas_call(
        kernel,
        out_shape=jax.ShapeDtypeStruct((B_pad, n_output), jnp.float32),
        grid=grid,
        in_specs=[
            # x streamed (double-buffered) over the batch grid axis.
            pl.BlockSpec((tile_b, n_input), lambda i: (i, 0)),
            # Single packed parameter block, constant index_map -> fetched
            # once and VMEM-resident across all grid steps.
            pl.BlockSpec(packed.shape, lambda i: (0, 0)),
        ],
        # Un-padded output feature dim: tiny masked store beats 128-lane
        # padded writeback + an extra slice op by a wide margin here.
        out_specs=pl.BlockSpec((tile_b, n_output), lambda i: (i, 0)),
        compiler_params=pltpu.CompilerParams(
            dimension_semantics=("parallel",),
        ),
    )(x, packed)

    return out[:B] if B_pad != B else out


def init_params(key, n_input=6, n_hidden=6, n_output=1):
    """Deterministic init mimicking the PyTorch module's initializers.

    l1, l2 weights: kaiming_uniform_(nonlinearity='relu') -> U(+/- sqrt(6/fan_in))
    l3 weight:      xavier_uniform_ -> U(+/- sqrt(6/(fan_in+fan_out)))
    biases:         nn.Linear default -> U(+/- 1/sqrt(fan_in))
    Weights stored transposed, i.e. (in, out), so the kernel does x @ W + b.
    """
    k1, k2, k3, kb1, kb2, kb3 = jax.random.split(key, 6)

    def kaiming_w(k, fan_in, fan_out):
        bound = math.sqrt(6.0 / fan_in)
        return jax.random.uniform(k, (fan_in, fan_out), jnp.float32, -bound, bound)

    def xavier_w(k, fan_in, fan_out):
        bound = math.sqrt(6.0 / (fan_in + fan_out))
        return jax.random.uniform(k, (fan_in, fan_out), jnp.float32, -bound, bound)

    def bias(k, fan_in, fan_out):
        bound = 1.0 / math.sqrt(fan_in)
        return jax.random.uniform(k, (1, fan_out), jnp.float32, -bound, bound)

    w1 = kaiming_w(k1, n_input, n_hidden)
    b1 = bias(kb1, n_input, n_hidden)
    w2 = kaiming_w(k2, n_hidden, n_hidden)
    b2 = bias(kb2, n_hidden, n_hidden)
    w3 = xavier_w(k3, n_hidden, n_output)
    b3 = bias(kb3, n_hidden, n_output)
    return w1, b1, w2, b2, w3, b3


def mlr_reference(x, w1, b1, w2, b2, w3, b3):
    h1 = jnp.maximum(x @ w1 + b1, 0.0)
    h2 = jnp.maximum(h1 @ w2 + b2, 0.0)
    logits = h2 @ w3 + b3
    return jax.nn.softmax(logits, axis=1)


if __name__ == "__main__":
    key = jax.random.PRNGKey(0)
    kx, kp, kx2, kp2 = jax.random.split(key, 4)

    # --- Case 1: module defaults (n_input=6, n_hidden=6, n_output=1). ---
    # softmax(dim=1) on a width-1 output is identically 1.0; the kernel's
    # static short-circuit matches the PyTorch reference exactly.
    n_input, n_hidden, n_output = 6, 6, 1
    batch = 256  # default tiling -> 2 equal tiles of 128

    x = jax.random.normal(kx, (batch, n_input), dtype=jnp.float32)
    params = init_params(kp, n_input, n_hidden, n_output)

    out = mlr_forward(x, *params)
    out = jax.block_until_ready(out)
    ref = mlr_reference(x, *params)
    assert out.shape == (batch, n_output)
    assert jnp.allclose(out, ref, atol=1e-5, rtol=1e-5)

    # --- Case 2: non-trivial softmax width + ragged batch (full compute path). ---
    n_input2, n_hidden2, n_output2 = 6, 8, 4
    batch2 = 300  # not a multiple of 8 -> exercises batch padding + final slice

    x2 = jax.random.normal(kx2, (batch2, n_input2), dtype=jnp.float32)
    params2 = init_params(kp2, n_input2, n_hidden2, n_output2)

    out2 = mlr_forward(x2, *params2)
    out2 = jax.block_until_ready(out2)
    ref2 = mlr_reference(x2, *params2)
    assert out2.shape == (batch2, n_output2)
    assert jnp.allclose(out2, ref2, atol=1e-5, rtol=1e-5)

    print("KERNEL_OK")
</pallas_src>

<mosaic_0001>
module attributes {stable_mosaic.version = 11 : i64} {
  func.func @mlr_kernel(%arg0: i32, %arg1: memref<128x6xf32, #tpu.memory_space<vmem>>, %arg2: memref<48x6xf32, #tpu.memory_space<vmem>>, %arg3: memref<128x1xf32, #tpu.memory_space<vmem>>) attributes {dimension_semantics = [#tpu.dimension_semantics<parallel>], iteration_bounds = array<i64: 2>, scalar_prefetch = 0 : i64, scratch_operands = 0 : i64, tpu.core_type = #tpu.core_type<tc>, window_params = [{transform_indices = @transform_0, window_bounds = array<i64: 128, 6>}, {pipeline_mode = #tpu.pipeline_mode<synchronous>, transform_indices = @transform_1, window_bounds = array<i64: 48, 6>}, {transform_indices = @transform_2, window_bounds = array<i64: 128, 1>}]} {
    %cst = arith.constant 1.000000e+00 : f32
    %0 = vector.broadcast %cst : f32 to vector<128x1xf32>
    %c0 = arith.constant 0 : index
    %c0_0 = arith.constant 0 : index
    %1 = vector.load %arg3[%c0, %c0_0] : memref<128x1xf32, #tpu.memory_space<vmem>>, vector<128x1xf32>
    tpu.vector_store %arg3[%c0, %c0_0], %0 {strides = array<i32>} : memref<128x1xf32, #tpu.memory_space<vmem>>, vector<128x1xf32>,
    return
  }
  func.func @transform_0(%arg0: i32) -> (i32, i32) {
    %c0_i32 = arith.constant 0 : i32
    %c0_i32_0 = arith.constant 0 : i32
    return %arg0, %c0_i32 : i32, i32
  }
  func.func @transform_1(%arg0: i32) -> (i32, i32) {
    %c0_i32 = arith.constant 0 : i32
    %c0_i32_0 = arith.constant 0 : i32
    %c0_i32_1 = arith.constant 0 : i32
    return %c0_i32, %c0_i32_0 : i32, i32
  }
  func.func @transform_2(%arg0: i32) -> (i32, i32) {
    %c0_i32 = arith.constant 0 : i32
    %c0_i32_0 = arith.constant 0 : i32
    return %arg0, %c0_i32 : i32, i32
  }
}

</mosaic_0001>

<bundles_post_ra>
// kernel: tpu_custom_call.1
= control target key start
LH: loop header
LB: loop body
LE: loop exit
PB: predicated region body
PF: predicated region fallthrough
CT: control target
= control target key end

     0   :  { %s262_s9 = smov 0   ;;  %s292_s0 = inlined_call_operand.vmem [shape: f32[256,6], index: 0, kind: input, shape index: {}]   ;;  %s293_s1 = inlined_call_operand.vmem [shape: f32[48,6], index: 1, kind: input, shape index: {}]   ;;  %s294_s2 = inlined_call_operand.vmem [shape: f32[256,1], index: 2, kind: output, shape index: {}]  }
   0x1 LB: > { %s220_s10 = sadd.s32 4294967295, %s244_s9   ;;  %p224_p0 = scmp.ge.s32.totalorder %s244_s9, 1  ;;  %s244_s9 = sphi %s262_s9, %s12_s9  }
   0x2   : > { %p113_p1 = scmp.lt.s32.totalorder %s244_s9, 3 }
   0x4   : > { %p114_p2 = pnand %p224_p0, %p113_p1 }
   0x5   : > { %s225_s0 = sshll.u32 (!%p114_p2), %s220_s10, 4  ;;  %vm147_vm0 = vcmask (!%p114_p2), 7168   ;;  %v246_v0 = vmov (!%p114_p2), 1.0  }
   0x6   : > { %117 = sbr.rel (%p114_p2) target bundleno = 24 (0x18), region = 28  ;;  %p142_p3 = scmp.lt.s32.totalorder (!%p114_p2), %s225_s0, 31 }
   0xd   : > { %s296_s0 = smov (!%p142_p3, %s225_s0), 31 }
   0xe   : > { %s226_s1 = sshll.u32 %s296_s0, 3 }
   0xf   : > { %s145_s13 = scalar_lea.vmem %s294_s2, %s226_s1 }
  0x10   : > { %148 = vst.msk [vmem:[%s145_s13] sm:$0xff] %vm147_vm0, %v246_v0  ;;  %149 = vst.msk [vmem:[%s145_s13 + $0x8] sm:$0xff] %vm147_vm0, %v246_v0 }
  0x11   : > { %150 = vst.msk [vmem:[%s145_s13 + $0x10] sm:$0xff] %vm147_vm0, %v246_v0  ;;  %151 = vst.msk [vmem:[%s145_s13 + $0x18] sm:$0xff] %vm147_vm0, %v246_v0 }
  0x12   : > { %152 = vst.msk [vmem:[%s145_s13 + $0x20] sm:$0xff] %vm147_vm0, %v246_v0  ;;  %153 = vst.msk [vmem:[%s145_s13 + $0x28] sm:$0xff] %vm147_vm0, %v246_v0 }
  0x13   : > { %154 = vst.msk [vmem:[%s145_s13 + $0x30] sm:$0xff] %vm147_vm0, %v246_v0  ;;  %155 = vst.msk [vmem:[%s145_s13 + $0x38] sm:$0xff] %vm147_vm0, %v246_v0 }
  0x14   : > { %156 = vst.msk [vmem:[%s145_s13 + $0x40] sm:$0xff] %vm147_vm0, %v246_v0  ;;  %157 = vst.msk [vmem:[%s145_s13 + $0x48] sm:$0xff] %vm147_vm0, %v246_v0 }
  0x15   : > { %158 = vst.msk [vmem:[%s145_s13 + $0x50] sm:$0xff] %vm147_vm0, %v246_v0  ;;  %159 = vst.msk [vmem:[%s145_s13 + $0x58] sm:$0xff] %vm147_vm0, %v246_v0 }
  0x16   : > { %160 = vst.msk [vmem:[%s145_s13 + $0x60] sm:$0xff] %vm147_vm0, %v246_v0  ;;  %161 = vst.msk [vmem:[%s145_s13 + $0x68] sm:$0xff] %vm147_vm0, %v246_v0 }
  0x17   : > { %162 = vst.msk [vmem:[%s145_s13 + $0x70] sm:$0xff] %vm147_vm0, %v246_v0  ;;  %163 = vst.msk [vmem:[%s145_s13 + $0x78] sm:$0xff] %vm147_vm0, %v246_v0 }
  0x18 PF: > { %s12_s9 = sadd.s32 1, %s244_s9  }
  0x19   : > { %p9_p4 = scmp.ge.s32.totalorder %s12_s9, 4  }
  0x1b   :  { %11 = sbr.rel (!%p9_p4) target bundleno = 1 (0x1), region = 58 }

</bundles_post_ra>
